<compile_context>
chip_gen: v7x
topology: tpu7x:2x2x1
jax: 0.10.0
libtpu: 0.0.40
codegen_flags: <defaults>
</compile_context>

<pallas_src>
import functools
import math

import jax
import jax.numpy as jnp
from jax.experimental import pallas as pl
from jax.experimental.pallas import tpu as pltpu

_LANE = 128


def _round_up(x, m):
    return ((x + m - 1) // m) * m


def _vmem_capacity_bytes():
    """Physical VMEM per TensorCore; conservative 64 MiB (v7x) fallback."""
    try:
        cap = int(pltpu.get_tpu_info().vmem_capacity_bytes)
        if cap > 0:
            return cap
    except Exception:
        pass
    return 64 * 2**20


def _pick_tile_k(mid_p, cap_k):
    """Largest multiple of 128 <= cap_k that divides mid_p (fallback cap_k)."""
    n = mid_p // _LANE
    for c in range(min(cap_k // _LANE, n), 0, -1):
        if n % c == 0:
            return c * _LANE
    return cap_k


def _resident_spec(shape, index_map):
    """BlockSpec for a constant-index (fully resident) operand.

    The block index never changes across the grid, so the second pipeline
    buffer Pallas allocates by default is pure VMEM waste -> single-buffer it.
    """
    try:
        return pl.BlockSpec(shape, index_map, pipeline_mode=pl.Buffered(1))
    except Exception:  # older jax without pipeline_mode / Buffered
        return pl.BlockSpec(shape, index_map)


# --------------------------------------------------------------------------- #
# Kernels
# --------------------------------------------------------------------------- #
def _ffn_kernel_fused(x_ref, w1_ref, b1_ref, w2_ref, b2_ref, o_ref):
    # x:(TM,in_p)  w1:(in_p,mid_p)  b1:(1,mid_p)  w2:(mid_p,out_p)  b2:(1,out_p)
    h = jnp.dot(x_ref[...], w1_ref[...], preferred_element_type=jnp.float32)
    h = jnp.maximum(h + b1_ref[...].astype(jnp.float32), 0.0)
    # Dropout(p=0.1) is identity in eval mode.
    out = jnp.dot(h.astype(w2_ref.dtype), w2_ref[...],
                  preferred_element_type=jnp.float32)
    o_ref[...] = (out + b2_ref[...].astype(jnp.float32)).astype(o_ref.dtype)


def _ffn_kernel_ktiled(x_ref, w1_ref, b1_ref, w2_ref, b2_ref, o_ref, acc_ref):
    # Hidden (mid) dimension tiled along grid axis 1 with an f32 accumulator.
    k = pl.program_id(1)

    @pl.when(k == 0)
    def _init():
        acc_ref[...] = jnp.zeros_like(acc_ref)

    h = jnp.dot(x_ref[...], w1_ref[...], preferred_element_type=jnp.float32)
    h = jnp.maximum(h + b1_ref[...].astype(jnp.float32), 0.0)
    acc_ref[...] += jnp.dot(h.astype(w2_ref.dtype), w2_ref[...],
                            preferred_element_type=jnp.float32)

    @pl.when(k == pl.num_programs(1) - 1)
    def _finalize():
        o_ref[...] = (acc_ref[...]
                      + b2_ref[...].astype(jnp.float32)).astype(o_ref.dtype)


# --------------------------------------------------------------------------- #
# Wrapper
# --------------------------------------------------------------------------- #
@functools.partial(jax.jit,
                   static_argnames=("tile_m", "tile_k", "compute_dtype"))
def ffn_forward(x, w1, b1, w2, b2, *, tile_m=None, tile_k=None,
                compute_dtype=None):
    """x: (B, S, in_size) -> (B, S, out_size).

    w1: (in_size, mid_size), b1: (mid_size,) or (1, mid_size)
    w2: (mid_size, out_size), b2: (out_size,) or (1, out_size)
    (weights stored transposed relative to torch.nn.Linear)

    compute_dtype: optional matmul operand dtype (e.g. jnp.bfloat16) — the MXU
    is bf16-native; accumulation is always f32.
    """
    B, S, in_size = x.shape
    mid_size = w1.shape[1]
    out_size = w2.shape[1]

    out_dt = jnp.dtype(x.dtype)
    cdt = jnp.dtype(compute_dtype) if compute_dtype is not None else out_dt
    c_item = cdt.itemsize
    o_item = out_dt.itemsize

    cap = _vmem_capacity_bytes()

    # ---- static tiling decisions ------------------------------------------ #
    in_p = _round_up(in_size, _LANE)
    mid_p = _round_up(mid_size, _LANE)
    out_p = _round_up(out_size, _LANE)

    # Hidden-dim (mid) tiling: only tile when mid is large (or user-requested).
    if tile_k is not None:
        tk = _round_up(int(tile_k), _LANE)
        mid_p = _round_up(mid_p, tk)
    else:
        tk_cap = 2048
        tk = mid_p if mid_p <= tk_cap else _pick_tile_k(mid_p, tk_cap)
        mid_p = _round_up(mid_p, tk)
    num_k = mid_p // tk
    k_tiled = num_k > 1

    # Row tile: dtype-aware sublane granularity, MXU-friendly 128-row multiples.
    sub = max(8, 32 // c_item)
    M = B * S
    if tile_m is None:
        tile_m = 512 if cap >= 100 * 2**20 else 256   # big tiles on 128MiB chips
    tm = min(int(tile_m), _round_up(M, sub))
    tm = _round_up(tm, sub)
    if tm >= _LANE:
        tm = _round_up(tm, _LANE)

    def _footprint(tm_):
        if k_tiled:  # weight blocks change with k -> default double buffering
            w_bytes = 2 * (in_p * tk + tk + tk * out_p) * c_item + out_p * c_item
            inter = tm_ * tk * 4 + tm_ * tk * c_item + tm_ * out_p * 4
        else:        # resident weights, single-buffered
            w_bytes = (in_p * mid_p + mid_p + mid_p * out_p + out_p) * c_item
            inter = tm_ * mid_p * 4 + tm_ * mid_p * c_item + tm_ * out_p * 4
        act = 2 * tm_ * in_p * c_item + 2 * tm_ * out_p * o_item
        return w_bytes + act + inter

    # Shrink tm until the working set fits comfortably (critical on v7x 64 MiB).
    while tm > sub and _footprint(tm) > int(0.70 * cap):
        tm = max(sub, _round_up(tm // 2, sub))

    M_p = _round_up(M, tm)
    # Give both v7x TensorCores something to do when M allows (>=2 grid steps).
    if M_p // tm < 2 and M > sub:
        tm = _round_up((M + 1) // 2, sub)
        M_p = _round_up(M, tm)
    grid_m = M_p // tm

    fp = _footprint(tm)
    vmem_limit = int(min(max(int(1.5 * fp), 32 * 2**20), int(0.85 * cap)))

    # ---- operand preparation (no-ops when already aligned) ---------------- #
    x2d = x.reshape(M, in_size)
    if cdt != out_dt:
        x2d = x2d.astype(cdt)
        w1 = w1.astype(cdt)
        w2 = w2.astype(cdt)
        # biases stay in their original dtype; they are added in f32 in-kernel.

    if (M_p != M) or (in_p != in_size):
        x2d = jnp.pad(x2d, ((0, M_p - M), (0, in_p - in_size)))
    w1p = w1 if (in_p == in_size and mid_p == mid_size) else jnp.pad(
        w1, ((0, in_p - in_size), (0, mid_p - mid_size)))
    b1r = b1.reshape(1, -1)
    b1p = b1r if mid_p == mid_size else jnp.pad(
        b1r, ((0, 0), (0, mid_p - mid_size)))
    w2p = w2 if (mid_p == mid_size and out_p == out_size) else jnp.pad(
        w2, ((0, mid_p - mid_size), (0, out_p - out_size)))
    b2r = b2.reshape(1, -1)
    b2p = b2r if out_p == out_size else jnp.pad(
        b2r, ((0, 0), (0, out_p - out_size)))

    flops = int(2 * M_p * (in_p * mid_p + mid_p * out_p))
    bytes_accessed = int(
        x2d.size * jnp.dtype(x2d.dtype).itemsize
        + (w1p.size + w2p.size) * c_item
        + (b1p.size * jnp.dtype(b1p.dtype).itemsize)
        + (b2p.size * jnp.dtype(b2p.dtype).itemsize)
        + M_p * out_p * o_item)

    # ---- grid / specs ------------------------------------------------------ #
    if k_tiled:
        grid = (grid_m, num_k)
        in_specs = [
            pl.BlockSpec((tm, in_p), lambda i, k: (i, 0)),
            pl.BlockSpec((in_p, tk), lambda i, k: (0, k)),
            pl.BlockSpec((1, tk), lambda i, k: (0, k)),
            pl.BlockSpec((tk, out_p), lambda i, k: (k, 0)),
            _resident_spec((1, out_p), lambda i, k: (0, 0)),
        ]
        out_specs = pl.BlockSpec((tm, out_p), lambda i, k: (i, 0))
        scratch = [pltpu.VMEM((tm, out_p), jnp.float32)]
        kernel = _ffn_kernel_ktiled
        dims = ("parallel", "arbitrary")
    else:
        grid = (grid_m,)
        in_specs = [
            pl.BlockSpec((tm, in_p), lambda i: (i, 0)),
            _resident_spec((in_p, mid_p), lambda i: (0, 0)),
            _resident_spec((1, mid_p), lambda i: (0, 0)),
            _resident_spec((mid_p, out_p), lambda i: (0, 0)),
            _resident_spec((1, out_p), lambda i: (0, 0)),
        ]
        out_specs = pl.BlockSpec((tm, out_p), lambda i: (i, 0))
        scratch = []
        kernel = _ffn_kernel_fused
        dims = ("parallel",)

    out2d = pl.pallas_call(
        kernel,
        out_shape=jax.ShapeDtypeStruct((M_p, out_p), out_dt),
        grid_spec=pltpu.PrefetchScalarGridSpec(
            num_scalar_prefetch=0,
            grid=grid,
            in_specs=in_specs,
            out_specs=out_specs,
            scratch_shapes=scratch),
        compiler_params=pltpu.CompilerParams(
            dimension_semantics=dims,
            vmem_limit_bytes=vmem_limit),
        cost_estimate=pl.CostEstimate(
            flops=flops, transcendentals=0, bytes_accessed=bytes_accessed),
    )(x2d, w1p, b1p, w2p, b2p)

    if (M_p != M) or (out_p != out_size):
        out2d = out2d[:M, :out_size]
    return out2d.reshape(B, S, out_size)


# --------------------------------------------------------------------------- #
# Init / reference / demo
# --------------------------------------------------------------------------- #
def init_ffn_params(key, in_size, mid_size, out_size, dtype=jnp.float32):
    """Deterministic init mirroring torch.nn.Linear's U(-1/sqrt(fan_in), +)."""
    k1, k2, k3, k4 = jax.random.split(key, 4)
    bound1 = 1.0 / math.sqrt(in_size)
    bound2 = 1.0 / math.sqrt(mid_size)
    # Stored transposed vs. torch: (in, mid), (mid, out).
    w1 = jax.random.uniform(k1, (in_size, mid_size), dtype, -bound1, bound1)
    b1 = jax.random.uniform(k2, (1, mid_size), dtype, -bound1, bound1)
    w2 = jax.random.uniform(k3, (mid_size, out_size), dtype, -bound2, bound2)
    b2 = jax.random.uniform(k4, (1, out_size), dtype, -bound2, bound2)
    return w1, b1, w2, b2


def _ref_ffn(x, w1, b1, w2, b2):
    B, S, in_size = x.shape
    h = jnp.maximum(x.reshape(-1, in_size) @ w1 + b1.reshape(1, -1), 0.0)
    out = h @ w2 + b2.reshape(1, -1)
    return out.reshape(B, S, -1)


if __name__ == "__main__":
    key = jax.random.PRNGKey(0)
    kx, kp, kx2, kp2, kx3 = jax.random.split(key, 5)

    # FFN(in=32, mid=128, out=32), input (batch=2, seq=8, in_size=32).
    B, S, in_size, mid_size, out_size = 2, 8, 32, 128, 32
    x = jax.random.normal(kx, (B, S, in_size), dtype=jnp.float32)
    w1, b1, w2, b2 = init_ffn_params(kp, in_size, mid_size, out_size)

    out = jax.block_until_ready(ffn_forward(x, w1, b1, w2, b2))
    ref = _ref_ffn(x, w1, b1, w2, b2)
    assert out.shape == (B, S, out_size)
    # Small slack: MXU default-precision f32 matmuls vs. the XLA reference.
    assert jnp.allclose(out, ref, atol=5e-3, rtol=5e-3)

    # Ragged B*S (not a multiple of 8) exercises the row-padding path.
    x_r = jax.random.normal(kx2, (3, 7, in_size), dtype=jnp.float32)
    out_r = jax.block_until_ready(ffn_forward(x_r, w1, b1, w2, b2))
    ref_r = _ref_ffn(x_r, w1, b1, w2, b2)
    assert out_r.shape == (3, 7, out_size)
    assert jnp.allclose(out_r, ref_r, atol=5e-3, rtol=5e-3)

    # bf16 compute path (MXU-native) for an f32 model.
    out_bf = jax.block_until_ready(
        ffn_forward(x, w1, b1, w2, b2, compute_dtype=jnp.bfloat16))
    assert jnp.allclose(out_bf, ref, atol=5e-2, rtol=5e-2)

    # Hidden-dim (mid) tiled path: force tile_k < mid to exercise accumulation.
    in2, mid2, out2 = 32, 256, 64
    x2 = jax.random.normal(kx3, (2, 8, in2), dtype=jnp.float32)
    params2 = init_ffn_params(kp2, in2, mid2, out2)
    out_k = jax.block_until_ready(ffn_forward(x2, *params2, tile_k=128))
    ref_k = _ref_ffn(x2, *params2)
    assert out_k.shape == (2, 8, out2)
    assert jnp.allclose(out_k, ref_k, atol=5e-3, rtol=5e-3)

    print("KERNEL_OK")
</pallas_src>

<mosaic_0001>
module attributes {stable_mosaic.version = 11 : i64} {
  func.func @_ffn_kernel_fused(%arg0: i32, %arg1: memref<8x128xf32, #tpu.memory_space<vmem>>, %arg2: memref<128x128xf32, #tpu.memory_space<vmem>>, %arg3: memref<1x128xf32, #tpu.memory_space<vmem>>, %arg4: memref<128x128xf32, #tpu.memory_space<vmem>>, %arg5: memref<1x128xf32, #tpu.memory_space<vmem>>, %arg6: memref<8x128xf32, #tpu.memory_space<vmem>>) attributes {dimension_semantics = [#tpu.dimension_semantics<parallel>], iteration_bounds = array<i64: 2>, scalar_prefetch = 0 : i64, scratch_operands = 0 : i64, tpu.core_type = #tpu.core_type<tc>, window_params = [{transform_indices = @transform_0, window_bounds = array<i64: 8, 128>}, {pipeline_mode = #tpu.pipeline_mode<synchronous>, transform_indices = @transform_1, window_bounds = array<i64: 128, 128>}, {pipeline_mode = #tpu.pipeline_mode<synchronous>, transform_indices = @transform_2, window_bounds = array<i64: 1, 128>}, {pipeline_mode = #tpu.pipeline_mode<synchronous>, transform_indices = @transform_3, window_bounds = array<i64: 128, 128>}, {pipeline_mode = #tpu.pipeline_mode<synchronous>, transform_indices = @transform_4, window_bounds = array<i64: 1, 128>}, {transform_indices = @transform_5, window_bounds = array<i64: 8, 128>}]} {
    %c0 = arith.constant 0 : index
    %c0_0 = arith.constant 0 : index
    %0 = vector.load %arg1[%c0, %c0_0] : memref<8x128xf32, #tpu.memory_space<vmem>>, vector<8x128xf32>
    %c0_1 = arith.constant 0 : index
    %c0_2 = arith.constant 0 : index
    %1 = vector.load %arg2[%c0_1, %c0_2] : memref<128x128xf32, #tpu.memory_space<vmem>>, vector<128x128xf32>
    %cst = arith.constant dense<0.000000e+00> : vector<8x128xf32>
    %2 = tpu.matmul %0, %1, %cst {dimension_numbers = #tpu.dot_dimension_numbers<[1], [0], [0], [1], [0, 0, 1, 1], [], []>} : vector<8x128xf32>, vector<128x128xf32>, vector<8x128xf32> -> vector<8x128xf32>
    %c0_3 = arith.constant 0 : index
    %c0_4 = arith.constant 0 : index
    %3 = vector.load %arg3[%c0_3, %c0_4] : memref<1x128xf32, #tpu.memory_space<vmem>>, vector<1x128xf32>
    %4 = vector.broadcast %3 : vector<1x128xf32> to vector<8x128xf32>
    %5 = arith.addf %2, %4 : vector<8x128xf32>
    %cst_5 = arith.constant 0.000000e+00 : f32
    %6 = vector.broadcast %cst_5 : f32 to vector<8x128xf32>
    %7 = arith.maximumf %5, %6 : vector<8x128xf32>
    %c0_6 = arith.constant 0 : index
    %c0_7 = arith.constant 0 : index
    %8 = vector.load %arg4[%c0_6, %c0_7] : memref<128x128xf32, #tpu.memory_space<vmem>>, vector<128x128xf32>
    %cst_8 = arith.constant dense<0.000000e+00> : vector<8x128xf32>
    %9 = tpu.matmul %7, %8, %cst_8 {dimension_numbers = #tpu.dot_dimension_numbers<[1], [0], [0], [1], [0, 0, 1, 1], [], []>} : vector<8x128xf32>, vector<128x128xf32>, vector<8x128xf32> -> vector<8x128xf32>
    %c0_9 = arith.constant 0 : index
    %c0_10 = arith.constant 0 : index
    %10 = vector.load %arg5[%c0_9, %c0_10] : memref<1x128xf32, #tpu.memory_space<vmem>>, vector<1x128xf32>
    %11 = vector.broadcast %10 : vector<1x128xf32> to vector<8x128xf32>
    %12 = arith.addf %9, %11 : vector<8x128xf32>
    %c0_11 = arith.constant 0 : index
    %c0_12 = arith.constant 0 : index
    %13 = vector.load %arg6[%c0_11, %c0_12] : memref<8x128xf32, #tpu.memory_space<vmem>>, vector<8x128xf32>
    tpu.vector_store %arg6[%c0_11, %c0_12], %12 {strides = array<i32>} : memref<8x128xf32, #tpu.memory_space<vmem>>, vector<8x128xf32>,
    return
  }
  func.func @transform_0(%arg0: i32) -> (i32, i32) {
    %c0_i32 = arith.constant 0 : i32
    %c0_i32_0 = arith.constant 0 : i32
    return %arg0, %c0_i32 : i32, i32
  }
  func.func @transform_1(%arg0: i32) -> (i32, i32) {
    %c0_i32 = arith.constant 0 : i32
    %c0_i32_0 = arith.constant 0 : i32
    %c0_i32_1 = arith.constant 0 : i32
    return %c0_i32, %c0_i32_0 : i32, i32
  }
  func.func @transform_2(%arg0: i32) -> (i32, i32) {
    %c0_i32 = arith.constant 0 : i32
    %c0_i32_0 = arith.constant 0 : i32
    %c0_i32_1 = arith.constant 0 : i32
    return %c0_i32, %c0_i32_0 : i32, i32
  }
  func.func @transform_3(%arg0: i32) -> (i32, i32) {
    %c0_i32 = arith.constant 0 : i32
    %c0_i32_0 = arith.constant 0 : i32
    %c0_i32_1 = arith.constant 0 : i32
    return %c0_i32, %c0_i32_0 : i32, i32
  }
  func.func @transform_4(%arg0: i32) -> (i32, i32) {
    %c0_i32 = arith.constant 0 : i32
    %c0_i32_0 = arith.constant 0 : i32
    %c0_i32_1 = arith.constant 0 : i32
    return %c0_i32, %c0_i32_0 : i32, i32
  }
  func.func @transform_5(%arg0: i32) -> (i32, i32) {
    %c0_i32 = arith.constant 0 : i32
    %c0_i32_0 = arith.constant 0 : i32
    return %arg0, %c0_i32 : i32, i32
  }
}

</mosaic_0001>

<bundles_post_ra>
// kernel: ffn_forward.1
= control target key start
LH: loop header
LB: loop body
LE: loop exit
PB: predicated region body
PF: predicated region fallthrough
CT: control target
= control target key end

     0   :  { %s677_s18 = smov 0   ;;  %s819_s0 = inlined_call_operand.vmem [shape: f32[16,128], index: 0, kind: input, shape index: {}]   ;;  %s820_s1 = inlined_call_operand.vmem [shape: f32[128,128], index: 1, kind: input, shape index: {}]   ;;  %s821_s2 = inlined_call_operand.vmem [shape: f32[1,128], index: 2, kind: input, shape index: {}]   ;;  %s822_s3 = inlined_call_operand.vmem [shape: f32[128,128], index: 3, kind: input, shape index: {}]   ;;  %s823_s4 = inlined_call_operand.vmem [shape: f32[1,128], index: 4, kind: input, shape index: {}]   ;;  %s824_s5 = inlined_call_operand.vmem [shape: f32[16,128], index: 5, kind: output, shape index: {}]  }
   0x1 LB: > { %s462_s19 = sadd.s32 4294967295, %s642_s18   ;;  %p466_p0 = scmp.ge.s32.totalorder %s642_s18, 1  ;;  %s642_s18 = sphi %s677_s18, %s15_s18  }
   0x2   : > { %p186_p1 = scmp.lt.s32.totalorder %s642_s18, 3 }
   0x4   : > { %p187_p2 = pnand %p466_p0, %p186_p1 }
   0x5   : > { %v221_v0 = vld [vmem:[%s820_s1] sm:$0xff] (!%p187_p2)  ;;  %v222_v1 = vld [vmem:[%s820_s1 + $0x8] sm:$0xff] (!%p187_p2)  ;;  %v223_v2 = vld [vmem:[%s820_s1 + $0x10] sm:$0xff] (!%p187_p2)  ;;  %v644_v3 = vmov (!%p187_p2), 0.0|0.0   ;;  %vm645_vm0 = vmmov (!%p187_p2), 0   ;;  %v646_v6 = vmov (!%p187_p2), 0.0  }
   0x6   : > { %190 = sbr.rel (%p187_p2) target bundleno = 470 (0x1d6), region = 40  ;;  %577 = vmatprep.subr.bf16.mxu0 (!%p187_p2), %v644_v3  ;;  %v578_v4 = vpack.c.bf16 (!%p187_p2), %v222_v1, %v221_v0  ;;  %v224_v5 = vld [vmem:[%s820_s1 + $0x18] sm:$0xff] (!%p187_p2)  ;;  %539 = vmatprep.mubr.msk.f32.mxu0 (!%p187_p2), %vm645_vm0, %v646_v6  ;;  %v225_v8 = vld [vmem:[%s820_s1 + $0x20] sm:$0xff] (!%p187_p2)  ;;  %v226_v9 = vld [vmem:[%s820_s1 + $0x28] sm:$0xff] (!%p187_p2)  ;;  %p212_p3 = scmp.lt.s32.totalorder (!%p187_p2), %s462_s19, 1 }
   0x7   : > { %601 = vmatprep.subr.bf16.mxu1 (!%p187_p2), %v644_v3  ;;  %574 = vmatprep.mubr.msk.f32.mxu1 (!%p187_p2), %vm645_vm0, %v646_v6  ;;  %v581_v7 = vpack.c.bf16 (!%p187_p2), %v224_v5, %v223_v2  ;;  %v315_v10 = vld [vmem:[%s822_s3] sm:$0xff] (!%p187_p2)  ;;  %v316_v11 = vld [vmem:[%s822_s3 + $0x8] sm:$0xff] (!%p187_p2)  ;;  %v317_v13 = vld [vmem:[%s822_s3 + $0x10] sm:$0xff] (!%p187_p2)  ;;  %v584_v15 = vpack.c.bf16 (!%p187_p2), %v226_v9, %v225_v8 }
   0x8   : > { %579 = vmatpush3.bf16.msra.mxu0 (!%p187_p2), %v578_v4  ;;  %v602_v12 = vpack.c.bf16 (!%p187_p2), %v316_v11, %v315_v10  ;;  %v318_v14 = vld [vmem:[%s822_s3 + $0x18] sm:$0xff] (!%p187_p2)  ;;  %v227_v16 = vld [vmem:[%s820_s1 + $0x30] sm:$0xff] (!%p187_p2)  ;;  %v319_v19 = vld [vmem:[%s822_s3 + $0x20] sm:$0xff] (!%p187_p2) }
   0x9   : > { %580 = vmatprep.subr.bf16.mxu0 (!%p187_p2), %v644_v3  ;;  %v228_v17 = vld [vmem:[%s820_s1 + $0x38] sm:$0xff] (!%p187_p2)  ;;  %v605_v18 = vpack.c.bf16 (!%p187_p2), %v318_v14, %v317_v13  ;;  %v320_v20 = vld [vmem:[%s822_s3 + $0x28] sm:$0xff] (!%p187_p2)  ;;  %v229_v22 = vld [vmem:[%s820_s1 + $0x40] sm:$0xff] (!%p187_p2) }
   0xa   : > { %603 = vmatpush3.bf16.msra.mxu1 (!%p187_p2), %v602_v12  ;;  %v587_v21 = vpack.c.bf16 (!%p187_p2), %v228_v17, %v227_v16  ;;  %v230_v23 = vld [vmem:[%s820_s1 + $0x48] sm:$0xff] (!%p187_p2)  ;;  %v608_v24 = vpack.c.bf16 (!%p187_p2), %v320_v20, %v319_v19  ;;  %v321_v25 = vld [vmem:[%s822_s3 + $0x30] sm:$0xff] (!%p187_p2)  ;;  %v322_v26 = vld [vmem:[%s822_s3 + $0x38] sm:$0xff] (!%p187_p2) }
   0xb   : > { %604 = vmatprep.subr.bf16.mxu1 (!%p187_p2), %v644_v3  ;;  %v590_v27 = vpack.c.bf16 (!%p187_p2), %v230_v23, %v229_v22  ;;  %v231_v28 = vld [vmem:[%s820_s1 + $0x50] sm:$0xff] (!%p187_p2)  ;;  %v232_v29 = vld [vmem:[%s820_s1 + $0x58] sm:$0xff] (!%p187_p2)  ;;  %v611_v30 = vpack.c.bf16 (!%p187_p2), %v322_v26, %v321_v25  ;;  %v323_v31 = vld [vmem:[%s822_s3 + $0x40] sm:$0xff] (!%p187_p2) }
   0xc   : > { %582 = vmatpush3.bf16.msra.mxu0 (!%p187_p2), %v581_v7  ;;  %v324_v32 = vld [vmem:[%s822_s3 + $0x48] sm:$0xff] (!%p187_p2)  ;;  %v593_v33 = vpack.c.bf16 (!%p187_p2), %v232_v29, %v231_v28  ;;  %v233_v34 = vld [vmem:[%s820_s1 + $0x60] sm:$0xff] (!%p187_p2)  ;;  %v325_v37 = vld [vmem:[%s822_s3 + $0x50] sm:$0xff] (!%p187_p2) }
   0xd   : > { %583 = vmatprep.subr.bf16.mxu0 %v644_v3  ;;  %v234_v35 = vld [vmem:[%s820_s1 + $0x68] sm:$0xff]  ;;  %v614_v36 = vpack.c.bf16 %v324_v32, %v323_v31  ;;  %s826_s19 = smov (!%p212_p3, %s462_s19), 1  ;;  %v326_v38 = vld [vmem:[%s822_s3 + $0x58] sm:$0xff]  ;;  %v235_v40 = vld [vmem:[%s820_s1 + $0x70] sm:$0xff] }
   0xe   : > { %606 = vmatpush3.bf16.msra.mxu1 %v605_v18  ;;  %v596_v39 = vpack.c.bf16 %v234_v35, %v233_v34  ;;  %v236_v41 = vld [vmem:[%s820_s1 + $0x78] sm:$0xff]  ;;  %v617_v42 = vpack.c.bf16 %v326_v38, %v325_v37  ;;  %s467_s30 = sshll.u32 %s826_s19, 3  ;;  %v327_v43 = vld [vmem:[%s822_s3 + $0x60] sm:$0xff]  ;;  %v328_v44 = vld [vmem:[%s822_s3 + $0x68] sm:$0xff] }
   0xf   : > { %607 = vmatprep.subr.bf16.mxu1 %v644_v3  ;;  %v599_v45 = vpack.c.bf16 %v236_v41, %v235_v40  ;;  %s215_s12 = scalar_lea.vmem %s819_s0, %s467_s30  ;;  %v620_v46 = vpack.c.bf16 %v328_v44, %v327_v43  ;;  %v329_v48 = vld [vmem:[%s822_s3 + $0x70] sm:$0xff]  ;;  %v330_v49 = vld [vmem:[%s822_s3 + $0x78] sm:$0xff]  ;;  %v469_v51 = vld [vmem:[%s821_s2] ss:$0 sm:$0xff]  ;;  %s219_s24 = scalar_lea.vmem %s824_s5, %s467_s30 }
  0x10   : > { %585 = vmatpush3.bf16.msra.mxu0 %v584_v15  ;;  %v220_v47 = vld [vmem:[%s215_s12] sm:$0xff]  ;;  %v623_v50 = vpack.c.bf16 %v330_v49, %v329_v48 }
  0x11   : > { %586 = vmatprep.subr.bf16.mxu0 %v644_v3  ;;  %v470_v56 = vld [vmem:[%s823_s4] ss:$0 sm:$0xff] }
  0x12   : > { %609 = vmatpush3.bf16.msra.mxu1 %v608_v24 }
  0x13   : > { %610 = vmatprep.subr.bf16.mxu1 %v644_v3 }
  0x14   : > { %588 = vmatpush3.bf16.msra.mxu0 %v587_v21 }
  0x15   : > { %589 = vmatprep.subr.bf16.mxu0 %v644_v3 }
  0x16   : > { %612 = vmatpush3.bf16.msra.mxu1 %v611_v30 }
  0x17   : > { %613 = vmatprep.subr.bf16.mxu1 %v644_v3 }
  0x18   : > { %591 = vmatpush3.bf16.msra.mxu0 %v590_v27 }
  0x19   : > { %592 = vmatprep.subr.bf16.mxu0 %v644_v3 }
  0x1a   : > { %615 = vmatpush3.bf16.msra.mxu1 %v614_v36 }
  0x1b   : > { %616 = vmatprep.subr.bf16.mxu1 %v644_v3 }
  0x1c   : > { %594 = vmatpush3.bf16.msra.mxu0 %v593_v33 }
  0x1d   : > { %595 = vmatprep.subr.bf16.mxu0 %v644_v3 }
  0x1e   : > { %618 = vmatpush3.bf16.msra.mxu1 %v617_v42 }
  0x1f   : > { %619 = vmatprep.subr.bf16.mxu1 %v644_v3 }
  0x20   : > { %597 = vmatpush3.bf16.msra.mxu0 %v596_v39 }
  0x21   : > { %598 = vmatprep.subr.bf16.mxu0 %v644_v3 }
  0x22   : > { %621 = vmatpush3.bf16.msra.mxu1 %v620_v46 }
  0x23   : > { %622 = vmatprep.subr.bf16.mxu1 %v644_v3 }
  0x24   : > { %600 = vmatpush3.bf16.msra.mxu0 %v599_v45 }
  0x26   : > { %624 = vmatpush3.bf16.msra.mxu1 %v623_v50 }
  0x27   : > { %540 = vmatmul.mubr.f32.vlgmr.msra.gmra.mrb[0].mxu0 %v220_v47 }
  0xfa   : > { %v310_v52 = vpop.f32.mrb[0].mxu0 }
  0xfb   : > { %v311_v53 = vadd.f32 %v469_v51, %v310_v52  ;;  %v541_v54 = vpop.f32.mrb[1].mxu0 }
  0xfd   : > { %v314_v55 = vmax.f32 %v311_v53, 0.0 }
  0xff   : > { %575 = vmatmul.mubr.f32.vlgmr.msra.gmra.mrb[0].mxu1 %v314_v55 }
 0x1d2   : > { %v404_v57 = vpop.f32.mrb[0].mxu1 }
 0x1d3   : > { %v405_v58 = vadd.f32 %v470_v56, %v404_v57  ;;  %v576_v59 = vpop.f32.mrb[1].mxu1 }
 0x1d5   : > { %408 = vst [vmem:[%s219_s24] sm:$0xff] %v405_v58 }
 0x1d6 PF: > { %s15_s18 = sadd.s32 1, %s642_s18  }
 0x1d7   : > { %p12_p4 = scmp.ge.s32.totalorder %s15_s18, 4  }
 0x1d9   :  { %14 = sbr.rel (!%p12_p4) target bundleno = 1 (0x1), region = 70 }

</bundles_post_ra>
